<compile_context>
chip_gen: v7x
topology: tpu7x:2x2x1
jax: 0.10.0
libtpu: 0.0.40
codegen_flags: <defaults>
</compile_context>

<pallas_src>
import math

import jax
import jax.numpy as jnp
import numpy as np
from jax.experimental import pallas as pl
from jax.experimental.pallas import tpu as pltpu


# ----------------------------------------------------------------------------
# W_pos builders (mirror of the PyTorch __init__ / helper functions).
# ----------------------------------------------------------------------------
def coord1d_pos_encoding(q_len, exponential=False, normalize=True):
    lin = jnp.linspace(0.0, 1.0, q_len, dtype=jnp.float32).reshape(-1, 1)
    cpe = 2.0 * lin ** (0.5 if exponential else 1.0) - 1.0
    if normalize:
        cpe = cpe - cpe.mean()
        cpe = cpe / (jnp.std(cpe, ddof=1) * 10.0)  # torch .std() is unbiased
    return cpe.astype(jnp.float32)


def coord2d_pos_encoding(q_len, d_model, exponential=False, normalize=True,
                         eps=1e-3):
    # TODO(synk): init-time only (host Python loop with float() readbacks);
    # not jit-traceable, and the torch version's verbose printing is omitted.
    x = 0.5 if exponential else 1.0
    row = jnp.linspace(0.0, 1.0, q_len, dtype=jnp.float32).reshape(-1, 1)
    col = jnp.linspace(0.0, 1.0, d_model, dtype=jnp.float32).reshape(1, -1)
    cpe = 2.0 * (row ** x) * (col ** x) - 1.0
    for _ in range(100):
        m = float(cpe.mean())
        if abs(m) <= eps:
            break
        x += 0.001 if m > eps else -0.001
        cpe = 2.0 * (row ** x) * (col ** x) - 1.0
    if normalize:
        cpe = cpe - cpe.mean()
        cpe = cpe / (jnp.std(cpe, ddof=1) * 10.0)
    return cpe.astype(jnp.float32)


def sincos_pos_encoding(q_len, d_model, normalize=True):
    position = jnp.arange(q_len, dtype=jnp.float32)[:, None]
    div_term = jnp.exp(jnp.arange(0, d_model, 2, dtype=jnp.float32) *
                       (-math.log(10000.0) / d_model))
    pe = jnp.zeros((q_len, d_model), dtype=jnp.float32)
    pe = pe.at[:, 0::2].set(jnp.sin(position * div_term))
    pe = pe.at[:, 1::2].set(jnp.cos(position * div_term))
    if normalize:
        pe = pe - pe.mean()
        pe = pe / (jnp.std(pe, ddof=1) * 10.0)
    return pe.astype(jnp.float32)


def build_w_pos(pe_type, q_len, d_model, key):
    """Mirror of Positional_Encoding.__init__ parameter construction.

    Random inits use jax.random (deterministic with the given key) instead of
    torch's RNG; the forward semantics (return W_pos) are unaffected.
    """
    if pe_type is None:
        return jax.random.uniform(key, (q_len, d_model), jnp.float32,
                                  minval=-0.02, maxval=0.02)
    if pe_type == 'zero':
        return jax.random.uniform(key, (q_len, 1), jnp.float32,
                                  minval=-0.02, maxval=0.02)
    if pe_type == 'zeros':
        return jax.random.uniform(key, (q_len, d_model), jnp.float32,
                                  minval=-0.02, maxval=0.02)
    if pe_type in ('normal', 'gauss'):
        return 0.1 * jax.random.normal(key, (q_len, 1), jnp.float32)
    if pe_type == 'uniform':
        return jax.random.uniform(key, (q_len, 1), jnp.float32,
                                  minval=0.0, maxval=0.1)
    if pe_type == 'lin1d':
        return coord1d_pos_encoding(q_len, exponential=False)
    if pe_type == 'exp1d':
        return coord1d_pos_encoding(q_len, exponential=True)
    if pe_type == 'lin2d':
        return coord2d_pos_encoding(q_len, d_model, exponential=False)
    if pe_type == 'exp2d':
        return coord2d_pos_encoding(q_len, d_model, exponential=True)
    if pe_type == 'sincos':
        return sincos_pos_encoding(q_len, d_model)
    raise ValueError(f"{pe_type} is not a valid pe type")


# ----------------------------------------------------------------------------
# Pallas forward kernel: forward() == return W_pos  (tiled identity).
# ----------------------------------------------------------------------------
def _copy_kernel(w_ref, o_ref):
    o_ref[...] = w_ref[...]


def _choose_row_tile(q_len, max_rows):
    """Sublane-aligned row tile, sized so the grid has >=2 steps when it can
    (v7x megacore) while staying <= max_rows (VMEM budget on v5e/v7x)."""
    if q_len <= 8:
        return q_len                       # block equals full row dim
    half = pl.cdiv(q_len, 2)
    tm = ((half + 7) // 8) * 8             # round up to sublane multiple
    return max(8, min(tm, max_rows))


def positional_encoding_forward(w_pos, *, max_block_rows=512,
                                max_block_cols=1024):
    """Pallas implementation of Positional_Encoding.forward().

    The forward is a pure identity on the parameter.  When d_model is a
    multiple of 128, a lane-dense tiled identity kernel is run with the
    output aliased onto the input buffer; otherwise ([q_len, 1] pe_types,
    odd d_model) the parameter is returned directly (no kernel, no masked
    stores, no VMEM risk) — exactly the module's semantics either way.
    """
    q_len, d_model = w_pos.shape

    if d_model % 128 != 0:
        return w_pos

    tm = _choose_row_tile(q_len, max_block_rows)
    tn = min(d_model, max_block_cols)      # multiple of 128 by construction
    grid = (pl.cdiv(q_len, tm), pl.cdiv(d_model, tn))

    itemsize = jnp.dtype(w_pos.dtype).itemsize
    return pl.pallas_call(
        _copy_kernel,
        out_shape=jax.ShapeDtypeStruct((q_len, d_model), w_pos.dtype),
        grid=grid,
        in_specs=[pl.BlockSpec((tm, tn), lambda i, j: (i, j))],
        out_specs=pl.BlockSpec((tm, tn), lambda i, j: (i, j)),
        input_output_aliases={0: 0},
        compiler_params=pltpu.CompilerParams(
            dimension_semantics=("parallel", "parallel")),
        cost_estimate=pl.CostEstimate(
            flops=0, transcendentals=0,
            bytes_accessed=2 * q_len * d_model * itemsize),
    )(w_pos)


# ----------------------------------------------------------------------------
# Demo / self-check.
# ----------------------------------------------------------------------------
if __name__ == "__main__":
    key = jax.random.PRNGKey(0)
    k1, k2 = jax.random.split(key)

    # Small shapes consistent with the module: W_pos is [q_len, d_model].
    q_len, d_model = 64, 128

    # Deterministic 'sincos' positional encoding exercises the kernel path
    # (d_model is a lane multiple -> tiled, aliased identity copy).
    w_pos_sincos = build_w_pos('sincos', q_len, d_model, k1)
    expected = np.asarray(w_pos_sincos)          # host copy (input is aliased)
    out = positional_encoding_forward(w_pos_sincos)
    jax.block_until_ready(out)
    assert out.shape == (q_len, d_model)
    assert np.array_equal(np.asarray(out), expected)

    # A [q_len, 1] pe_type ('gauss') exercises the no-kernel identity path.
    w_pos_gauss = build_w_pos('gauss', q_len, d_model, k2)
    out2 = positional_encoding_forward(w_pos_gauss)
    jax.block_until_ready(out2)
    assert out2.shape == (q_len, 1)
    assert jnp.array_equal(out2, w_pos_gauss)

    print("KERNEL_OK")
</pallas_src>

<mosaic_0001>
module attributes {stable_mosaic.version = 11 : i64} {
  func.func @_copy_kernel(%arg0: i32, %arg1: i32, %arg2: memref<32x128xf32, #tpu.memory_space<vmem>>, %arg3: memref<32x128xf32, #tpu.memory_space<vmem>>) attributes {dimension_semantics = [#tpu.dimension_semantics<parallel>, #tpu.dimension_semantics<parallel>], iteration_bounds = array<i64: 2, 1>, scalar_prefetch = 0 : i64, scratch_operands = 0 : i64, tpu.core_type = #tpu.core_type<tc>, window_params = [{transform_indices = @transform_0, window_bounds = array<i64: 32, 128>}, {transform_indices = @transform_1, window_bounds = array<i64: 32, 128>}]} {
    %c0 = arith.constant 0 : index
    %c0_0 = arith.constant 0 : index
    %0 = vector.load %arg2[%c0, %c0_0] : memref<32x128xf32, #tpu.memory_space<vmem>>, vector<32x128xf32>
    %c0_1 = arith.constant 0 : index
    %c0_2 = arith.constant 0 : index
    %1 = vector.load %arg3[%c0_1, %c0_2] : memref<32x128xf32, #tpu.memory_space<vmem>>, vector<32x128xf32>
    tpu.vector_store %arg3[%c0_1, %c0_2], %0 {strides = array<i32>} : memref<32x128xf32, #tpu.memory_space<vmem>>, vector<32x128xf32>,
    return
  }
  func.func @transform_0(%arg0: i32, %arg1: i32) -> (i32, i32) {
    %c0_i32 = arith.constant 0 : i32
    return %arg0, %arg1 : i32, i32
  }
  func.func @transform_1(%arg0: i32, %arg1: i32) -> (i32, i32) {
    %c0_i32 = arith.constant 0 : i32
    return %arg0, %arg1 : i32, i32
  }
}

</mosaic_0001>

<bundles_post_ra>
// kernel: tpu_custom_call.1
= control target key start
LH: loop header
LB: loop body
LE: loop exit
PB: predicated region body
PF: predicated region fallthrough
CT: control target
= control target key end

     0   :  { %6 = vsyncpa [#allocation3], 0  ;;  %s650_s0 = inlined_call_operand.hbm [shape: f32[64,128], index: 0, kind: input, shape index: {}, may-alias: {0,1}]   ;;  %s651_s1 = inlined_call_operand.hbm [shape: f32[64,128], index: 1, kind: output, shape index: {}, may-alias: {0,1}]  }
   0x1   :  { %8 = vsyncpa [#allocation3 + $0x1], 0 }
   0x2   :  { %9 = vsyncpa [#allocation4], 0 }
   0x3   :  { %11 = vsyncpa [#allocation4 + $0x1], 0  ;;  %s475_s6 = smov 0   ;;  %s477_s7 = smov 0  }
   0x4   :  { %s479_s8 = smov 0   ;;  %s481_s9 = smov 0  }
   0x5   :  { %s483_s10 = smov 0   ;;  %s485_s11 = smov 0  }
   0x6 LB: > { %s262_s12 = sadd.s32 4294967295, %s457_s11   ;;  %s263_s13 = sadd.s32 4294967294, %s457_s11   ;;  %s457_s11 = sphi %s485_s11, %s17_s11   ;;  %s453_s10 = sphi %s483_s10, %s666_s10   ;;  %s449_s9 = sphi %s481_s9, %s665_s9   ;;  %s445_s8 = sphi %s479_s8, %s664_s8   ;;  %s441_s7 = sphi %s477_s7, %s663_s7   ;;  %s437_s6 = sphi %s475_s6, %s662_s6  }
   0x7   : > { %s29_s14 = sadd.s32 1, %s453_s10  ;;  %s38_s15 = sadd.s32 1, %s445_s8 }
   0x8   : > { %p31_p0 = scmp.ge.s32.totalorder %s29_s14, 2  ;;  %p45_p1 = scmp.ne.s32.totalorder %s445_s8, %s441_s7 }
   0x9   : > { %p46_p2 = scmp.eq.s32.totalorder %s457_s11, 0  ;;  %p51_p3 = scmp.ne.s32.totalorder %s441_s7, %s437_s6 }
   0xa   : > { %s668_s14 = smov (%p31_p0, %s29_s14), 0  ;;  %p52_p5 = scmp.eq.s32.totalorder %s262_s12, 0 }
   0xb   : > { %p516_p4 = por %p46_p2, %p45_p1  ;;  %s33_s17 = ssub.s32 %s453_s10, %s668_s14 }
   0xc   : > { %p77_p6 = scmp.eq.s32.totalorder %s262_s12, 1  ;;  %p36_p7 = scmp.eq.s32.totalorder %s33_s17, 0 }
   0xd   : > { %p522_p8 = por %p52_p5, %p51_p3  ;;  %p83_p10 = scmp.eq.s32.totalorder %s263_s13, 1 }
   0xe   : > { %p526_p9 = por %p77_p6, %p45_p1  ;;  %p291_p13 = scmp.lt.s32.totalorder %s457_s11, 2 }
   0xf   : > { %s531_s20 = scalar_select %p36_p7, %s445_s8, %s38_s15  }
  0x10   : > { %s655_s19 = scalar_select %p526_p9, 1, 0 }
  0x11   : > { %p533_p11 = por %p83_p10, %p51_p3  ;;  %s103_s22 = sand.u32 1, %s445_s8  }
  0x12   : > { %s266_s23 = sshll.u32 %s103_s22, 5  ;;  %s277_s24 = sshll.u32 %s453_s10, 9 }
  0x13   : > { %s656_s21 = scalar_select %p533_p11, 1, 0 }
  0x14   : > { %s544_s27 = scalar_lea.hbm %s650_s0, %s277_s24  ;;  %s107_s28 = scalar_lea.vmem [#allocation2], %s266_s23 }
  0x15   : > { %s115_s29 = sshll.u32 %s107_s28, 4  ;;  %p550_p0 = pnand %p291_p13, %p516_p4  ;;  %s546_s29 = int_to_ptr.vmem [resolvable:$true] %s115_s29 }
  0x16   : > { %s555_s2 = scalar_lea.sflag [#allocation3], %s103_s22  ;;  %s345_s3 = scalar_lea.hbm %s544_s27, 512 }
  0x17   : > { %p346_p2 = scmp.ne.s32.totalorder %s544_s27, %s345_s3  ;;  %p347_p3 = pneg %p550_p0 }
  0x18   : > { %s350_s12 = scalar_lea.hbm %s650_s0, 1024  ;;  %p351_p4 = scmp.lt.u32.totalorder %s544_s27, %s650_s0 }
  0x19   : > { %p348_p5 = pnand %p347_p3, %p346_p2  ;;  %p352_p7 = scmp.lt.u32.totalorder %s350_s12, %s345_s3 }
  0x1a   : > { %p354_p13 = scmp.lt.u32.totalorder %s345_s3, %s544_s27 }
  0x1b   : > { %p349_p6 = pneg %p348_p5  ;;  %p353_p10 = por %p352_p7, %p351_p4 }
  0x1d   : > { %p355_p12 = por %p354_p13, %p353_p10 }
  0x1f   : > { %p356_p1 = pnand %p355_p12, %p349_p6 }
  0x21   : > { %359 = shalt.err (!%p356_p1)
}
  0x22   : > { %s360_s16 = scalar_lea.vmem %s546_s29, 512  ;;  %s459_s17 = smov [#allocation2]  }
  0x23   : > { %p361_p2 = scmp.ne.s32.totalorder %s546_s29, %s360_s16  ;;  %s365_s22 = sshll.u32 %s459_s17, 4  ;;  %s366_s22 = int_to_ptr.vmem [resolvable:$false] %s365_s22 }
  0x24   : > { %s367_s23 = scalar_lea.vmem %s366_s22, 1024  ;;  %p368_p9 = scmp.lt.s32.totalorder %s546_s29, %s366_s22 }
  0x25   : > { %p363_p5 = pnand %p361_p2, %p347_p3  ;;  %p369_p4 = scmp.lt.s32.totalorder %s367_s23, %s360_s16 }
  0x27   : > { %p364_p11 = pneg %p363_p5  ;;  %p370_p7 = por %p369_p4, %p368_p9 }
  0x29   : > { %p371_p10 = pnand %p370_p7, %p364_p11 }
  0x2b   : > { %374 = shalt.err (!%p371_p10)
}
  0x2c   : > { %s460_s24 = smov 128   ;;  %s461_s25 = smov 8  }
  0x2d   : > { %286 = dma.hbm_to_vmem [thread:$0]  (!%p550_p0), %s544_s27, 512, %s546_s29, %s555_s2, %s460_s24, %s460_s24, %s461_s25  }
  0x2e   : > { %p123_p12 = scmp.lt.s32.totalorder %s457_s11, 3  ;;  %p658_p1 = scmp.ge.s32.totalorder %s457_s11, 1 }
  0x30   : > { %p124_p3 = pnand %p658_p1, %p123_p12 }
  0x31   : > { %s587_s26 = sand.u32 (!%p124_p3), 1, %s441_s7  }
  0x32   : > { %127 = sbr.rel (%p124_p3) target bundleno = 85 (0x55), region = 24  ;;  %s270_s28 = sshll.u32 (!%p124_p3), %s587_s26, 5 }
  0x33   : > { %s130_s3 = scalar_lea.sflag (!%p124_p3), [#allocation3], %s587_s26  ;;  %s133_s4 = scalar_lea.vmem (!%p124_p3), [#allocation2], %s270_s28 }
  0x39   : > { %428 = dma.done.wait (%p522_p8), %s130_s3, 512  }
  0x3a   : > { %430 = vsyncadd (%p522_p8), %s130_s3, 4294966784  ;;  %s151_s27 = scalar_lea.vmem [#allocation5], %s270_s28  ;;  %s278_s30 = sshll.u32 %s449_s9, 9  ;;  %v154_v0 = vld [vmem:[%s133_s4] sm:$0xff]  ;;  %v155_v1 = vld [vmem:[%s133_s4 + $0x8] sm:$0xff] }
  0x3b   : > { %s177_s29 = sshll.u32 %s151_s27, 4  ;;  %s601_s12 = scalar_lea.hbm %s651_s1, %s278_s30  ;;  %v156_v2 = vld [vmem:[%s133_s4 + $0x10] sm:$0xff]  ;;  %158 = vst [vmem:[%s151_s27] sm:$0xff] %v154_v0  ;;  %159 = vst [vmem:[%s151_s27 + $0x8] sm:$0xff] %v155_v1  ;;  %v157_v3 = vld [vmem:[%s133_s4 + $0x18] sm:$0xff]  ;;  %s596_s29 = int_to_ptr.vmem [resolvable:$true] %s177_s29 }
  0x3c   : > { %160 = vst [vmem:[%s151_s27 + $0x10] sm:$0xff] %v156_v2  ;;  %161 = vst [vmem:[%s151_s27 + $0x18] sm:$0xff] %v157_v3  ;;  %s163_s18 = scalar_lea.sflag [#allocation4], %s587_s26  ;;  %s375_s9 = scalar_lea.vmem %s596_s29, 512 }
  0x3d   : > { %p376_p8 = scmp.ne.s32.totalorder %s596_s29, %s375_s9  ;;  %p659_p9 = scmp.ne.s32.totalorder %s655_s19, 0 }
  0x3e   : > { %s462_s13 = smov [#allocation5]  }
  0x3f   : > { %p377_p11 = pnand %p376_p8, %p659_p9  ;;  %s379_s15 = sshll.u32 %s462_s13, 4  ;;  %s380_s15 = int_to_ptr.vmem [resolvable:$false] %s379_s15 }
  0x40   : > { %s381_s16 = scalar_lea.vmem %s380_s15, 1024  ;;  %p382_p6 = scmp.lt.s32.totalorder %s596_s29, %s380_s15 }
  0x41   : > { %p378_p0 = pneg %p377_p11  ;;  %p383_p13 = scmp.lt.s32.totalorder %s381_s16, %s375_s9 }
  0x43   : > { %p384_p2 = por %p383_p13, %p382_p6 }
  0x45   : > { %p385_p5 = pnand %p384_p2, %p378_p0 }
  0x47   : > { %388 = shalt.err (!%p385_p5)
}
  0x48   : > { %s389_s17 = scalar_lea.hbm %s601_s12, 512  ;;  %s393_s24 = scalar_lea.hbm %s651_s1, 1024 }
  0x49   : > { %p390_p4 = scmp.ne.s32.totalorder %s601_s12, %s389_s17  ;;  %p394_p12 = scmp.lt.u32.totalorder %s601_s12, %s651_s1 }
  0x4a   : > { %p395_p1 = scmp.lt.u32.totalorder %s393_s24, %s389_s17  ;;  %p397_p8 = scmp.lt.u32.totalorder %s389_s17, %s601_s12 }
  0x4b   : > { %p391_p7 = pnand %p390_p4, %p659_p9 }
  0x4c   : > { %p396_p3 = por %p395_p1, %p394_p12 }
  0x4d   : > { %p392_p10 = pneg %p391_p7 }
  0x4e   : > { %p398_p11 = por %p397_p8, %p396_p3 }
  0x50   : > { %p399_p0 = pnand %p398_p11, %p392_p10 }
  0x52   : > { %402 = shalt.err (!%p399_p0)
}
  0x53   : > { %s463_s3 = smov 128   ;;  %s464_s4 = smov 8  }
  0x54   : > { %281 = dma.vmem_to_hbm [thread:$0]  (%p659_p9), %s596_s29, 512, %s601_s12, %s163_s18, %s463_s3, %s463_s3, %s464_s4  }
  0x55 PF: > { %s192_s27 = sand.u32 1, %s437_s6   ;;  %p660_p6 = scmp.ne.s32.totalorder %s656_s21, 0 }
  0x56   : > { %p661_p13 = scmp.ge.s32.totalorder %s457_s11, 2  ;;  %s193_s30 = scalar_lea.sflag [#allocation4], %s192_s27 }
  0x58   : > { %p288_p2 = pnand %p661_p13, %p660_p6 }
  0x5a   : > { %432 = dma.done.wait (!%p288_p2), %s193_s30, 512  }
  0x5b   : > { %434 = vsyncadd (!%p288_p2), %s193_s30, 4294966784  ;;  %s17_s11 = sadd.s32 1, %s457_s11   ;;  %s662_s6 = smov %s441_s7 }
  0x5c   : > { %p14_p5 = scmp.ge.s32.totalorder %s17_s11, 4   ;;  %s663_s7 = smov %s445_s8 }
  0x5d   : > { %s664_s8 = smov %s531_s20  ;;  %s665_s9 = smov %s453_s10 }
  0x5e   : > { %s666_s10 = smov %s668_s14  ;;  %16 = sbr.rel (!%p14_p5) target bundleno = 6 (0x6), region = 69 }
  0x65   :  { %198 = vsyncpa [#allocation3], 1 }
  0x66   :  { %200 = vsyncpa [#allocation3 + $0x1], 1 }
  0x67   :  { %201 = vsyncpa [#allocation4], 1 }
  0x68   :  { %203 = vsyncpa [#allocation4 + $0x1], 1 }

</bundles_post_ra>
